<compile_context>
chip_gen: v5e
topology: v5e:2x2
jax: 0.10.0
libtpu: 0.0.40
codegen_flags: <defaults>
</compile_context>

<pallas_src>
import functools

import jax
import jax.numpy as jnp
from jax import lax
from jax.experimental import pallas as pl
from jax.experimental.pallas import tpu as pltpu


def _gauss_linear_mean_kernel(noise_ref, x_ref, w_ref, a_ref, b_ref, o_ref,
                              *, n_sample):
    # noise_ref: (S*N, DZ)  all samples stacked along rows
    # x_ref:     (N, DX)
    # w_ref:     (DZ, DZ)
    # a_ref:     (DZ, DX)   nn.Linear weight; contracted on DX (no host .T)
    # b_ref:     (1, DZ)
    # o_ref:     (S*N, DZ)
    mean = lax.dot_general(
        x_ref[...], a_ref[...],
        dimension_numbers=(((1,), (1,)), ((), ())),   # == X @ A^T
        preferred_element_type=jnp.float32) + b_ref[...]
    z = jnp.dot(noise_ref[...], w_ref[...],
                preferred_element_type=jnp.float32)
    # Broadcast the (N, DZ) mean over the S samples stacked along rows.
    o_ref[...] = (z + jnp.tile(mean, (n_sample, 1))).astype(o_ref.dtype)


def gauss_linear_mean_forward(noise, X, W, A, b):
    """out[s] = noise[s] @ W + (X @ A^T + b)   for every sample s."""
    S, N, DZ = noise.shape
    _, DX = X.shape
    rows = S * N
    noise_flat = noise.reshape(rows, DZ)      # metadata-only reshape
    b2 = b.reshape(1, DZ)

    kernel = functools.partial(_gauss_linear_mean_kernel, n_sample=S)

    out_flat = pl.pallas_call(
        kernel,
        out_shape=jax.ShapeDtypeStruct((rows, DZ), noise.dtype),
        grid_spec=pl.GridSpec(
            grid=(1,),                                        # single step
            in_specs=[
                pl.BlockSpec((rows, DZ), lambda i: (0, 0)),   # noise (flat)
                pl.BlockSpec((N, DX),    lambda i: (0, 0)),   # X
                pl.BlockSpec((DZ, DZ),   lambda i: (0, 0)),   # W
                pl.BlockSpec((DZ, DX),   lambda i: (0, 0)),   # A
                pl.BlockSpec((1, DZ),    lambda i: (0, 0)),   # b
            ],
            out_specs=pl.BlockSpec((rows, DZ), lambda i: (0, 0)),
        ),
        compiler_params=pltpu.CompilerParams(
            dimension_semantics=("arbitrary",)),
    )(noise_flat, X, W, A, b2)

    return out_flat.reshape(S, N, DZ)


if __name__ == "__main__":
    # Small shapes consistent with the module:
    #   noise: (n_sample, n, dz), X: (n, dx)
    n_sample = 4     # S
    n = 8            # batch of conditioning inputs
    dx = 16
    dz = 32

    key = jax.random.PRNGKey(0)
    k_noise, k_x, k_a, k_b = jax.random.split(key, 4)

    noise = jax.random.normal(k_noise, (n_sample, n, dz), dtype=jnp.float32)
    X = jax.random.normal(k_x, (n, dx), dtype=jnp.float32)

    # Deterministic parameter init (shapes from the inner module):
    #   mean_fn = nn.Linear(dx, dz)  -> A: (dz, dx), b: (dz,)
    #   W = Parameter(torch.eye(dz)) -> (dz, dz)
    bound = 1.0 / (dx ** 0.5)
    A = jax.random.uniform(k_a, (dz, dx), minval=-bound, maxval=bound,
                           dtype=jnp.float32)
    b = jax.random.uniform(k_b, (dz,), minval=-bound, maxval=bound,
                           dtype=jnp.float32)
    W = jnp.eye(dz, dtype=jnp.float32)

    out = gauss_linear_mean_forward(noise, X, W, A, b)
    out = jax.block_until_ready(out)

    # Pure-JAX reference for correctness.
    ref = noise @ W + (X @ A.T + b)[None, :, :]
    assert out.shape == (n_sample, n, dz)
    assert jnp.allclose(out, ref, atol=1e-5, rtol=1e-5)

    print("KERNEL_OK")
</pallas_src>

<mosaic_0001>
module attributes {stable_mosaic.version = 11 : i64} {
  func.func @_gauss_linear_mean_kernel(%arg0: i32, %arg1: memref<32x32xf32, #tpu.memory_space<vmem>>, %arg2: memref<8x16xf32, #tpu.memory_space<vmem>>, %arg3: memref<32x32xf32, #tpu.memory_space<vmem>>, %arg4: memref<32x16xf32, #tpu.memory_space<vmem>>, %arg5: memref<1x32xf32, #tpu.memory_space<vmem>>, %arg6: memref<32x32xf32, #tpu.memory_space<vmem>>) attributes {dimension_semantics = [#tpu.dimension_semantics<arbitrary>], iteration_bounds = array<i64: 1>, scalar_prefetch = 0 : i64, scratch_operands = 0 : i64, tpu.core_type = #tpu.core_type<tc>, window_params = [{pipeline_mode = #tpu.pipeline_mode<synchronous>, transform_indices = @transform_0, window_bounds = array<i64: 32, 32>}, {pipeline_mode = #tpu.pipeline_mode<synchronous>, transform_indices = @transform_1, window_bounds = array<i64: 8, 16>}, {pipeline_mode = #tpu.pipeline_mode<synchronous>, transform_indices = @transform_2, window_bounds = array<i64: 32, 32>}, {pipeline_mode = #tpu.pipeline_mode<synchronous>, transform_indices = @transform_3, window_bounds = array<i64: 32, 16>}, {pipeline_mode = #tpu.pipeline_mode<synchronous>, transform_indices = @transform_4, window_bounds = array<i64: 1, 32>}, {pipeline_mode = #tpu.pipeline_mode<synchronous>, transform_indices = @transform_5, window_bounds = array<i64: 32, 32>}]} {
    %c0 = arith.constant 0 : index
    %c0_0 = arith.constant 0 : index
    %0 = vector.load %arg2[%c0, %c0_0] : memref<8x16xf32, #tpu.memory_space<vmem>>, vector<8x16xf32>
    %c0_1 = arith.constant 0 : index
    %c0_2 = arith.constant 0 : index
    %1 = vector.load %arg4[%c0_1, %c0_2] : memref<32x16xf32, #tpu.memory_space<vmem>>, vector<32x16xf32>
    %cst = arith.constant dense<0.000000e+00> : vector<8x32xf32>
    %2 = tpu.matmul %0, %1, %cst {dimension_numbers = #tpu.dot_dimension_numbers<[1], [1], [0], [0], [0, 0, 1, 0], [], []>} : vector<8x16xf32>, vector<32x16xf32>, vector<8x32xf32> -> vector<8x32xf32>
    %c0_3 = arith.constant 0 : index
    %c0_4 = arith.constant 0 : index
    %3 = vector.load %arg5[%c0_3, %c0_4] : memref<1x32xf32, #tpu.memory_space<vmem>>, vector<1x32xf32>
    %4 = vector.broadcast %3 : vector<1x32xf32> to vector<8x32xf32>
    %5 = arith.addf %2, %4 : vector<8x32xf32>
    %c0_5 = arith.constant 0 : index
    %c0_6 = arith.constant 0 : index
    %6 = vector.load %arg1[%c0_5, %c0_6] : memref<32x32xf32, #tpu.memory_space<vmem>>, vector<32x32xf32>
    %c0_7 = arith.constant 0 : index
    %c0_8 = arith.constant 0 : index
    %7 = vector.load %arg3[%c0_7, %c0_8] : memref<32x32xf32, #tpu.memory_space<vmem>>, vector<32x32xf32>
    %cst_9 = arith.constant dense<0.000000e+00> : vector<32x32xf32>
    %8 = tpu.matmul %6, %7, %cst_9 {dimension_numbers = #tpu.dot_dimension_numbers<[1], [0], [0], [1], [0, 0, 1, 1], [], []>} : vector<32x32xf32>, vector<32x32xf32>, vector<32x32xf32> -> vector<32x32xf32>
    %9 = tpu.concatenate %5, %5, %5, %5 in 0 : vector<8x32xf32>, vector<8x32xf32>, vector<8x32xf32>, vector<8x32xf32> -> vector<32x32xf32>
    %10 = arith.addf %8, %9 : vector<32x32xf32>
    %c0_10 = arith.constant 0 : index
    %c0_11 = arith.constant 0 : index
    %11 = vector.load %arg6[%c0_10, %c0_11] : memref<32x32xf32, #tpu.memory_space<vmem>>, vector<32x32xf32>
    tpu.vector_store %arg6[%c0_10, %c0_11], %10 {strides = array<i32>} : memref<32x32xf32, #tpu.memory_space<vmem>>, vector<32x32xf32>,
    return
  }
  func.func @transform_0(%arg0: i32) -> (i32, i32) {
    %c0_i32 = arith.constant 0 : i32
    %c0_i32_0 = arith.constant 0 : i32
    %c0_i32_1 = arith.constant 0 : i32
    return %c0_i32, %c0_i32_0 : i32, i32
  }
  func.func @transform_1(%arg0: i32) -> (i32, i32) {
    %c0_i32 = arith.constant 0 : i32
    %c0_i32_0 = arith.constant 0 : i32
    %c0_i32_1 = arith.constant 0 : i32
    return %c0_i32, %c0_i32_0 : i32, i32
  }
  func.func @transform_2(%arg0: i32) -> (i32, i32) {
    %c0_i32 = arith.constant 0 : i32
    %c0_i32_0 = arith.constant 0 : i32
    %c0_i32_1 = arith.constant 0 : i32
    return %c0_i32, %c0_i32_0 : i32, i32
  }
  func.func @transform_3(%arg0: i32) -> (i32, i32) {
    %c0_i32 = arith.constant 0 : i32
    %c0_i32_0 = arith.constant 0 : i32
    %c0_i32_1 = arith.constant 0 : i32
    return %c0_i32, %c0_i32_0 : i32, i32
  }
  func.func @transform_4(%arg0: i32) -> (i32, i32) {
    %c0_i32 = arith.constant 0 : i32
    %c0_i32_0 = arith.constant 0 : i32
    %c0_i32_1 = arith.constant 0 : i32
    return %c0_i32, %c0_i32_0 : i32, i32
  }
  func.func @transform_5(%arg0: i32) -> (i32, i32) {
    %c0_i32 = arith.constant 0 : i32
    %c0_i32_0 = arith.constant 0 : i32
    %c0_i32_1 = arith.constant 0 : i32
    return %c0_i32, %c0_i32_0 : i32, i32
  }
}

</mosaic_0001>

<bundles_post_ra>
// kernel: tpu_custom_call.1
= control target key start
LH: loop header
LB: loop body
LE: loop exit
PB: predicated region body
PF: predicated region fallthrough
CT: control target
= control target key end

     0   :  { %10 = vsyncpa [#allocation3], 0  ;;  %s314_s0 = inlined_call_operand.vmem [shape: f32[32,32], index: 0, kind: input, shape index: {}]   ;;  %s315_s1 = inlined_call_operand.vmem [shape: f32[8,16], index: 1, kind: input, shape index: {}]   ;;  %s316_s2 = inlined_call_operand.hbm [shape: f32[32,32], index: 2, kind: input, shape index: {}]   ;;  %s317_s3 = inlined_call_operand.vmem [shape: f32[32,16], index: 3, kind: input, shape index: {}]   ;;  %s318_s4 = inlined_call_operand.vmem [shape: f32[1,32], index: 4, kind: input, shape index: {}]   ;;  %s319_s5 = inlined_call_operand.hbm [shape: f32[32,32], index: 5, kind: output, shape index: {}]  }
   0x1   :  { %11 = vsyncpa [#allocation4], 0  ;;  %s20_s20 = sshll.u32 %s316_s2, 4  ;;  %s225_s21 = smov [#allocation2]   ;;  %s21_s20 = int_to_ptr.hbm [resolvable:$true] %s20_s20 }
   0x2   :  { %s22_s22 = sshll.u32 %s225_s21, 4  ;;  %s226_s23 = smov 128   ;;  %s23_s22 = int_to_ptr.vmem [resolvable:$true] %s22_s22 }
   0x3   :  { %s227_s24 = smov 8  }
   0x4   :  { %28 = dma.hbm_to_vmem [thread:$0]  %s21_s20, 512, %s23_s22, [#allocation3], %s226_s23, %s226_s23, %s227_s24  }
   0x5   :  { %221 = dma.done.wait [#allocation3], 512  }
   0x6   :  { %222 = vsyncadd [#allocation3], 4294966784  ;;  %vm46_vm0 = vcmask 130048   ;;  %v41_v0 = vld [vmem:[%s317_s3 + $0x18] sm:$0xff]  ;;  %v88_v2 = vld [vmem:[#allocation2 + $0x10] sm:$0xff]  ;;  %vm90_vm1 = vcmask 261120  }
   0x7   :  { %v89_v1 = vld [vmem:[#allocation2 + $0x18] sm:$0xff]  ;;  %155 = vmatpush.xpose.msk.msra.mxu0 %vm46_vm0, %v41_v0  ;;  %v40_v3 = vld [vmem:[%s317_s3 + $0x10] sm:$0xff]  ;;  %v87_v4 = vld [vmem:[#allocation2 + $0x8] sm:$0xff]  ;;  %s142_s20 = sshll.u32 %s319_s5, 4  ;;  %s143_s20 = int_to_ptr.hbm [resolvable:$true] %s142_s20 }
   0x8   :  { %164 = vmatpush.msra.mxu2 %v89_v1  ;;  %115 = vmatpush.msra.mxu1 %v89_v1  ;;  %v86_v5 = vld [vmem:[#allocation2] sm:$0xff]  ;;  %v84_v6 = vld [vmem:[%s314_s0 + $0x10] sm:$0xff]  ;;  %v39_v7 = vld [vmem:[%s317_s3 + $0x8] sm:$0xff] }
   0x9   :  { %v82_v8 = vld [vmem:[%s314_s0] sm:$0xff]  ;;  %v85_v11 = vld [vmem:[%s314_s0 + $0x18] sm:$0xff]  ;;  %v83_v12 = vld [vmem:[%s314_s0 + $0x8] sm:$0xff] }
   0xa   :  { %165 = vmatpush.msra.mxu2 %v88_v2  ;;  %116 = vmatpush.msra.mxu1 %v88_v2  ;;  %v38_v9 = vld [vmem:[%s317_s3] sm:$0xff] }
   0xb   :  { %156 = vmatpush.xpose.msk.msra.mxu0 %vm46_vm0, %v40_v3  ;;  %v37_v10 = vld [vmem:[%s315_s1] sm:$0xff]  ;;  %s228_s1 = smov [#allocation5]  }
   0xc   :  { %166 = vmatpush.msra.mxu2 %v87_v4  ;;  %117 = vmatpush.msra.mxu1 %v87_v4  ;;  %v172_v14 = vld [vmem:[%s318_s4] ss:$0 sm:$0xff]  ;;  %s140_s0 = sshll.u32 %s228_s1, 4  ;;  %s141_s0 = int_to_ptr.vmem [resolvable:$true] %s140_s0 }
   0xe   :  { %167 = vmatpush.msra.mxu2 %v86_v5  ;;  %118 = vmatpush.msra.mxu1 %v86_v5 }
   0xf   :  { %162 = vmatmul.msk.f32.vlgmr.msra.gmra.mxu2 %vm90_vm1, %v84_v6  ;;  %157 = vmatpush.xpose.msk.msra.mxu0 %vm46_vm0, %v39_v7 }
  0x10   :  { %160 = vmatmul.msk.f32.vlgmr.msra.gmra.mxu1 %vm90_vm1, %v82_v8 }
  0x13   :  { %158 = vmatpush.xpose.msk.msra.mxu0 %vm46_vm0, %v38_v9 }
  0x16   :  { %159 = vmatmul.msk.f32.vlgmr.msra.gmra.mxu0 %vm46_vm0, %v37_v10 }
  0x17   :  { %163 = vmatmul.msk.f32.gmra.mxu2 %vm90_vm1, %v85_v11 }
  0x18   :  { %161 = vmatmul.msk.f32.gmra.mxu1 %vm90_vm1, %v83_v12 }
  0x8d   :  { %v120_v13 = vpop.f32.mrf.mxu1 }
  0x92   :  { %v126_v15 = vpop.f32.mrf.mxu2 }
  0x93   :  { %v79_v16 = vpop.f32.mrf.mxu0 }
  0x94   :  { %v80_v17 = vadd.f32 %v172_v14, %v79_v16 }
  0x95   :  { %v123_v18 = vpop.f32.mrf.mxu1 }
  0x96   :  { %v121_v19 = vadd.f32 %v120_v13, %v80_v17  ;;  %v127_v20 = vadd.f32 %v126_v15, %v80_v17  ;;  %v124_v21 = vadd.f32 %v123_v18, %v80_v17 }
  0x98   :  { %132 = vst.msk [vmem:[#allocation5] sm:$0xff] %vm90_vm1, %v121_v19 }
  0x99   :  { %134 = vst.msk [vmem:[#allocation5 + $0x10] sm:$0xff] %vm90_vm1, %v127_v20 }
  0x9a   :  { %v129_v22 = vpop.f32.mrf.mxu2  ;;  %133 = vst.msk [vmem:[#allocation5 + $0x8] sm:$0xff] %vm90_vm1, %v124_v21 }
  0x9b   :  { %v130_v23 = vadd.f32 %v129_v22, %v80_v17 }
  0x9d   :  { %135 = vst.msk [vmem:[#allocation5 + $0x18] sm:$0xff] %vm90_vm1, %v130_v23 }
  0x9e   :  { %148 = dma.vmem_to_hbm [thread:$0]  %s141_s0, 512, %s143_s20, [#allocation4], %s226_s23, %s226_s23, %s227_s24  }
  0x9f   :  { %223 = dma.done.wait [#allocation4], 512  }
  0xa0   :  { %224 = vsyncadd [#allocation4], 4294966784 }
  0xa1   :  { %153 = vsyncpa [#allocation3], 1 }
  0xa2   :  { %154 = vsyncpa [#allocation4], 1 }

</bundles_post_ra>
